<compile_context>
chip_gen: v7x
topology: tpu7x:2x2x1
jax: 0.10.0
libtpu: 0.0.40
codegen_flags: <defaults>
</compile_context>

<pallas_src>
import math
import functools

import jax
import jax.numpy as jnp
from jax.experimental import pallas as pl
from jax.experimental.pallas import tpu as pltpu


def _round_up(x, m):
    return ((x + m - 1) // m) * m


def _pad_dim(d):
    # Lane-align each feature dim per layer:
    #   <=256 -> multiple of 128 (minimum lane tile; fills v5e's 128x128 MXU)
    #   > 256 -> multiple of 256 (fills the 2x256x256 MXU on v6e/v7x)
    return _round_up(d, 128) if d <= 256 else _round_up(d, 256)


# ---------------------------------------------------------------------------
# Fused MLP kernel: push one row-tile of x through all layers on-chip.
# ---------------------------------------------------------------------------
def _fused_mlp_kernel(*refs, num_layers, d_out):
    # refs = (x_ref, w_0 .. w_{L-1}, b_0 .. b_{L-1}, o_ref)
    #   x_ref : (tm, d_in)        f32   row tile of the flattened input
    #   w_i   : (k_pad_i, n_pad_i) bf16 per-layer zero-padded weight (VMEM-resident)
    #   b_i   : (1, n_pad_i)       f32  per-layer zero-padded bias   (VMEM-resident)
    #   o_ref : (tm, d_out)        f32  final-layer output tile
    x_ref = refs[0]
    w_refs = refs[1:1 + num_layers]
    b_refs = refs[1 + num_layers:1 + 2 * num_layers]
    o_ref = refs[1 + 2 * num_layers]

    # Cast f32 -> bf16 on-chip (kernel streams f32 x from HBM; no separate
    # XLA cast pass over x in the wrapper).
    h = x_ref[...].astype(jnp.bfloat16)

    for layer in range(num_layers):                 # static unroll; L is small
        w = w_refs[layer][...]                      # (k_pad, n_pad) bf16
        acc = jnp.dot(h, w, preferred_element_type=jnp.float32)   # MXU, f32 acc
        acc = acc + b_refs[layer][...]              # (1, n_pad) f32 broadcast
        if layer < num_layers - 1:
            # Bias/ReLU epilogue in f32 (v5e has no bf16 VPU), bf16 for next MXU pass.
            # TODO(synk): on v6e/v7x a bf16 epilogue would halve VPU/vreg traffic.
            h = jnp.maximum(acc, 0.0).astype(jnp.bfloat16)
        else:
            result = acc if acc.shape[-1] == d_out else acc[:, :d_out]
            # Narrow (d_out < 128) stores lower to masked vst.msk, but at small
            # d_out the output stream is only d_out*4 B/row (far below the x
            # read), so padding the stored width to 128 lanes would multiply
            # HBM write traffic for no net win.  Pallas masks the final partial
            # row-block store automatically (no reliance on downstream slicing).
            # TODO(synk): for mid-sized non-128-multiple d_out, repack (tm,d_out)
            # into a lane-dense (tm*d_out/128, 128) slab in-kernel (free wrapper
            # reshape) to get unmasked vst without extra HBM bytes.
            o_ref[...] = result.astype(o_ref.dtype)


def mlp_forward_pallas(params, x, *, tm=None):
    """params: list of (W [in,out], b [out]); x: [..., input_dim] -> [..., output_dim]."""
    lead = x.shape[:-1]
    d_in = x.shape[-1]
    M = int(math.prod(lead)) if lead else 1
    num_layers = len(params)
    out_dims = [w.shape[1] for w, _ in params]
    d_out = out_dims[-1]

    # Per-layer padded dims.  Layer 0 consumes the raw (unpadded) x width; each
    # later layer consumes the previous layer's padded output width (those
    # padded columns are exactly zero: zero W columns + zero bias + ReLU).
    pad_out = [_pad_dim(d) for d in out_dims]
    pad_in = [d_in] + pad_out[:-1]

    # --- pack weights (done once at init time in a real model) ---------------
    w_pads, b_pads = [], []
    for li, (w, b) in enumerate(params):
        wp = jnp.pad(w.astype(jnp.bfloat16),
                     ((0, pad_in[li] - w.shape[0]), (0, pad_out[li] - w.shape[1])))
        bp = jnp.pad(b.astype(jnp.float32), (0, pad_out[li] - b.shape[0]))[None, :]
        w_pads.append(wp)
        b_pads.append(bp)

    resident_bytes = (sum(int(w.size) * 2 for w in w_pads)
                      + sum(int(b.size) * 4 for b in b_pads))
    # Constant index_map => resident blocks never change; single-buffer them
    # once they are big enough to matter (halves resident VMEM on v7x's
    # 64 MiB/core and under v5e's 16 MiB scoped default).
    single_buffer = resident_bytes > (4 << 20)
    resident_kw = dict(pipeline_mode=pl.Buffered(1)) if single_buffer else {}

    # --- row-tile size: big enough for HBM roofline, small enough that each
    #     TensorCore gets >=4 pipelined grid steps and everything fits VMEM ----
    max_pad = max(pad_out + [d_in])
    per_row_bytes = 2 * 4 * d_in + 2 * 4 * d_out + 6 * max_pad  # dbl-buf x/out + live h/acc
    tile_budget = (24 << 20) - (1 if single_buffer else 2) * resident_bytes
    row_cap = max(16, (max(tile_budget, 1 << 20) // per_row_bytes) // 16 * 16)
    if tm is None:
        tm_eff = _round_up(max(pl.cdiv(M, 8), 16), 16)   # ~8 grid steps -> >=4 per core on v7x
    else:
        tm_eff = _round_up(max(int(tm), 16), 16)
    tm_eff = max(16, min(tm_eff, 1024, row_cap))
    if tm_eff >= M:
        tm_eff = M                                       # single full-row block (always legal)
    grid = (pl.cdiv(M, tm_eff),)                         # partial last block masked by Pallas

    x_flat = x.reshape(M, d_in)
    if x_flat.dtype != jnp.bfloat16:
        x_flat = x_flat.astype(jnp.float32)              # kernel casts to bf16 on-chip

    in_specs = [pl.BlockSpec((tm_eff, d_in), lambda r: (r, 0))]          # x row tile
    in_specs += [pl.BlockSpec(w.shape, lambda r: (0, 0), **resident_kw)  # weights (resident)
                 for w in w_pads]
    in_specs += [pl.BlockSpec(b.shape, lambda r: (0, 0), **resident_kw)  # biases  (resident)
                 for b in b_pads]
    out_specs = pl.BlockSpec((tm_eff, d_out), lambda r: (r, 0))

    flops = 2 * M * sum(pad_in[i] * pad_out[i] for i in range(num_layers))
    bytes_accessed = (M * d_in * int(x_flat.dtype.itemsize)
                      + resident_bytes + M * d_out * 4)
    vmem_need = (2 * tm_eff * d_in * 4 + 2 * tm_eff * d_out * 4
                 + (1 if single_buffer else 2) * resident_bytes + (4 << 20))
    vmem_limit = int(min(max(vmem_need, 32 << 20), 64 << 20))   # capped for v7x (64 MiB/core)

    kernel = functools.partial(_fused_mlp_kernel, num_layers=num_layers, d_out=d_out)

    out = pl.pallas_call(
        kernel,
        out_shape=jax.ShapeDtypeStruct((M, d_out), jnp.float32),
        grid_spec=pltpu.PrefetchScalarGridSpec(
            num_scalar_prefetch=0,
            grid=grid,
            in_specs=in_specs,
            out_specs=out_specs,
        ),
        compiler_params=pltpu.CompilerParams(
            dimension_semantics=("parallel",),            # row tiles -> both TCs on v7x
            vmem_limit_bytes=vmem_limit),
        cost_estimate=pl.CostEstimate(flops=flops, transcendentals=0,
                                      bytes_accessed=bytes_accessed),
    )(x_flat, *w_pads, *b_pads)

    return out.reshape(*lead, d_out)


# ---------------------------------------------------------------------------
# PyTorch-style init and pure-JAX references
# ---------------------------------------------------------------------------
def _init_linear(key, in_dim, out_dim):
    kw, kb = jax.random.split(key)
    bound = 1.0 / math.sqrt(in_dim)
    w = jax.random.uniform(kw, (in_dim, out_dim), jnp.float32, -bound, bound)
    b = jax.random.uniform(kb, (out_dim,), jnp.float32, -bound, bound)
    return w, b


def init_mlp(key, num_layers, input_dim, hidden_dim, output_dim):
    if num_layers < 1:
        raise ValueError("number of layers should be positive!")
    if num_layers == 1:
        dims = [(input_dim, output_dim)]
    else:
        dims = ([(input_dim, hidden_dim)]
                + [(hidden_dim, hidden_dim)] * (num_layers - 2)
                + [(hidden_dim, output_dim)])
    keys = jax.random.split(key, num_layers)
    return [_init_linear(k, di, do) for k, (di, do) in zip(keys, dims)]


def mlp_reference(params, x, *, match_kernel_precision=False):
    h = x.astype(jnp.float32)
    num_layers = len(params)
    for layer, (w, b) in enumerate(params):
        if match_kernel_precision:
            out = jnp.dot(h.astype(jnp.bfloat16), w.astype(jnp.bfloat16),
                          preferred_element_type=jnp.float32) + b
        else:
            out = jnp.dot(h, w, precision=jax.lax.Precision.HIGHEST) + b
        if layer < num_layers - 1:
            out = jax.nn.relu(out)
        h = out
    return h


if __name__ == "__main__":
    key = jax.random.PRNGKey(0)
    k_param, k_x = jax.random.split(key)

    # Small shapes consistent with the module's forward: x is
    # [num_classes * batch_size, N, F_in] node-feature batches.
    num_layers, input_dim, hidden_dim, output_dim = 3, 16, 32, 8
    B, N = 8, 64

    params = init_mlp(k_param, num_layers, input_dim, hidden_dim, output_dim)
    x = jax.random.normal(k_x, (B, N, input_dim), jnp.float32)

    out = mlp_forward_pallas(params, x)   # M=512 rows -> auto tm=64, grid=(8,)
    out = jax.block_until_ready(out)
    assert out.shape == (B, N, output_dim)

    # Tight check against a reference using the same numerics (bf16 MXU inputs,
    # f32 accumulation/epilogue) -- validates kernel / BlockSpec / boundary plumbing.
    ref_matched = mlp_reference(params, x, match_kernel_precision=True)
    assert jnp.allclose(out, ref_matched, atol=1e-4, rtol=1e-4)

    # Loose check against a full-f32 (PyTorch-like) reference; the gap is the
    # intentional bf16 cast of the MXU inputs (inference-grade precision).
    ref_f32 = mlp_reference(params, x, match_kernel_precision=False)
    assert jnp.allclose(out, ref_f32, atol=0.25, rtol=0.05)

    print("KERNEL_OK")
</pallas_src>

<mosaic_0001>
module attributes {stable_mosaic.version = 11 : i64} {
  func.func @_fused_mlp_kernel(%arg0: i32, %arg1: memref<64x16xf32, #tpu.memory_space<vmem>>, %arg2: memref<16x128xbf16, #tpu.memory_space<vmem>>, %arg3: memref<128x128xbf16, #tpu.memory_space<vmem>>, %arg4: memref<128x128xbf16, #tpu.memory_space<vmem>>, %arg5: memref<1x128xf32, #tpu.memory_space<vmem>>, %arg6: memref<1x128xf32, #tpu.memory_space<vmem>>, %arg7: memref<1x128xf32, #tpu.memory_space<vmem>>, %arg8: memref<64x8xf32, #tpu.memory_space<vmem>>) attributes {dimension_semantics = [#tpu.dimension_semantics<parallel>], iteration_bounds = array<i64: 8>, scalar_prefetch = 0 : i64, scratch_operands = 0 : i64, tpu.core_type = #tpu.core_type<tc>, window_params = [{transform_indices = @transform_0, window_bounds = array<i64: 64, 16>}, {pipeline_mode = #tpu.pipeline_mode<synchronous>, transform_indices = @transform_1, window_bounds = array<i64: 16, 128>}, {pipeline_mode = #tpu.pipeline_mode<synchronous>, transform_indices = @transform_2, window_bounds = array<i64: 128, 128>}, {pipeline_mode = #tpu.pipeline_mode<synchronous>, transform_indices = @transform_3, window_bounds = array<i64: 128, 128>}, {pipeline_mode = #tpu.pipeline_mode<synchronous>, transform_indices = @transform_4, window_bounds = array<i64: 1, 128>}, {pipeline_mode = #tpu.pipeline_mode<synchronous>, transform_indices = @transform_5, window_bounds = array<i64: 1, 128>}, {pipeline_mode = #tpu.pipeline_mode<synchronous>, transform_indices = @transform_6, window_bounds = array<i64: 1, 128>}, {transform_indices = @transform_7, window_bounds = array<i64: 64, 8>}]} {
    %c0 = arith.constant 0 : index
    %c0_0 = arith.constant 0 : index
    %0 = vector.load %arg1[%c0, %c0_0] : memref<64x16xf32, #tpu.memory_space<vmem>>, vector<64x16xf32>
    %1 = arith.truncf %0 : vector<64x16xf32> to vector<64x16xbf16>
    %c0_1 = arith.constant 0 : index
    %c0_2 = arith.constant 0 : index
    %2 = vector.load %arg2[%c0_1, %c0_2] : memref<16x128xbf16, #tpu.memory_space<vmem>>, vector<16x128xbf16>
    %cst = arith.constant dense<0.000000e+00> : vector<64x128xf32>
    %3 = tpu.matmul %1, %2, %cst {dimension_numbers = #tpu.dot_dimension_numbers<[1], [0], [0], [1], [0, 0, 1, 1], [], []>} : vector<64x16xbf16>, vector<16x128xbf16>, vector<64x128xf32> -> vector<64x128xf32>
    %c0_3 = arith.constant 0 : index
    %c0_4 = arith.constant 0 : index
    %4 = vector.load %arg5[%c0_3, %c0_4] : memref<1x128xf32, #tpu.memory_space<vmem>>, vector<1x128xf32>
    %5 = vector.broadcast %4 : vector<1x128xf32> to vector<64x128xf32>
    %6 = arith.addf %3, %5 : vector<64x128xf32>
    %cst_5 = arith.constant 0.000000e+00 : f32
    %7 = vector.broadcast %cst_5 : f32 to vector<64x128xf32>
    %8 = arith.maximumf %6, %7 : vector<64x128xf32>
    %9 = arith.truncf %8 : vector<64x128xf32> to vector<64x128xbf16>
    %c0_6 = arith.constant 0 : index
    %c0_7 = arith.constant 0 : index
    %10 = vector.load %arg3[%c0_6, %c0_7] : memref<128x128xbf16, #tpu.memory_space<vmem>>, vector<128x128xbf16>
    %cst_8 = arith.constant dense<0.000000e+00> : vector<64x128xf32>
    %11 = tpu.matmul %9, %10, %cst_8 {dimension_numbers = #tpu.dot_dimension_numbers<[1], [0], [0], [1], [0, 0, 1, 1], [], []>} : vector<64x128xbf16>, vector<128x128xbf16>, vector<64x128xf32> -> vector<64x128xf32>
    %c0_9 = arith.constant 0 : index
    %c0_10 = arith.constant 0 : index
    %12 = vector.load %arg6[%c0_9, %c0_10] : memref<1x128xf32, #tpu.memory_space<vmem>>, vector<1x128xf32>
    %13 = vector.broadcast %12 : vector<1x128xf32> to vector<64x128xf32>
    %14 = arith.addf %11, %13 : vector<64x128xf32>
    %cst_11 = arith.constant 0.000000e+00 : f32
    %15 = vector.broadcast %cst_11 : f32 to vector<64x128xf32>
    %16 = arith.maximumf %14, %15 : vector<64x128xf32>
    %17 = arith.truncf %16 : vector<64x128xf32> to vector<64x128xbf16>
    %c0_12 = arith.constant 0 : index
    %c0_13 = arith.constant 0 : index
    %18 = vector.load %arg4[%c0_12, %c0_13] : memref<128x128xbf16, #tpu.memory_space<vmem>>, vector<128x128xbf16>
    %cst_14 = arith.constant dense<0.000000e+00> : vector<64x128xf32>
    %19 = tpu.matmul %17, %18, %cst_14 {dimension_numbers = #tpu.dot_dimension_numbers<[1], [0], [0], [1], [0, 0, 1, 1], [], []>} : vector<64x128xbf16>, vector<128x128xbf16>, vector<64x128xf32> -> vector<64x128xf32>
    %c0_15 = arith.constant 0 : index
    %c0_16 = arith.constant 0 : index
    %20 = vector.load %arg7[%c0_15, %c0_16] : memref<1x128xf32, #tpu.memory_space<vmem>>, vector<1x128xf32>
    %21 = vector.broadcast %20 : vector<1x128xf32> to vector<64x128xf32>
    %22 = arith.addf %19, %21 : vector<64x128xf32>
    %23 = vector.extract_strided_slice %22 {offsets = [0, 0], sizes = [64, 8], strides = [1, 1]} : vector<64x128xf32> to vector<64x8xf32>
    %c0_17 = arith.constant 0 : index
    %c0_18 = arith.constant 0 : index
    %24 = vector.load %arg8[%c0_17, %c0_18] : memref<64x8xf32, #tpu.memory_space<vmem>>, vector<64x8xf32>
    tpu.vector_store %arg8[%c0_17, %c0_18], %23 {strides = array<i32>} : memref<64x8xf32, #tpu.memory_space<vmem>>, vector<64x8xf32>,
    return
  }
  func.func @transform_0(%arg0: i32) -> (i32, i32) {
    %c0_i32 = arith.constant 0 : i32
    %c0_i32_0 = arith.constant 0 : i32
    return %arg0, %c0_i32 : i32, i32
  }
  func.func @transform_1(%arg0: i32) -> (i32, i32) {
    %c0_i32 = arith.constant 0 : i32
    %c0_i32_0 = arith.constant 0 : i32
    %c0_i32_1 = arith.constant 0 : i32
    return %c0_i32, %c0_i32_0 : i32, i32
  }
  func.func @transform_2(%arg0: i32) -> (i32, i32) {
    %c0_i32 = arith.constant 0 : i32
    %c0_i32_0 = arith.constant 0 : i32
    %c0_i32_1 = arith.constant 0 : i32
    return %c0_i32, %c0_i32_0 : i32, i32
  }
  func.func @transform_3(%arg0: i32) -> (i32, i32) {
    %c0_i32 = arith.constant 0 : i32
    %c0_i32_0 = arith.constant 0 : i32
    %c0_i32_1 = arith.constant 0 : i32
    return %c0_i32, %c0_i32_0 : i32, i32
  }
  func.func @transform_4(%arg0: i32) -> (i32, i32) {
    %c0_i32 = arith.constant 0 : i32
    %c0_i32_0 = arith.constant 0 : i32
    %c0_i32_1 = arith.constant 0 : i32
    return %c0_i32, %c0_i32_0 : i32, i32
  }
  func.func @transform_5(%arg0: i32) -> (i32, i32) {
    %c0_i32 = arith.constant 0 : i32
    %c0_i32_0 = arith.constant 0 : i32
    %c0_i32_1 = arith.constant 0 : i32
    return %c0_i32, %c0_i32_0 : i32, i32
  }
  func.func @transform_6(%arg0: i32) -> (i32, i32) {
    %c0_i32 = arith.constant 0 : i32
    %c0_i32_0 = arith.constant 0 : i32
    %c0_i32_1 = arith.constant 0 : i32
    return %c0_i32, %c0_i32_0 : i32, i32
  }
  func.func @transform_7(%arg0: i32) -> (i32, i32) {
    %c0_i32 = arith.constant 0 : i32
    %c0_i32_0 = arith.constant 0 : i32
    return %arg0, %c0_i32 : i32, i32
  }
}

</mosaic_0001>

<bundles_post_ra>
// kernel: tpu_custom_call.1
= control target key start
LH: loop header
LB: loop body
LE: loop exit
PB: predicated region body
PF: predicated region fallthrough
CT: control target
= control target key end

     0   :  { %s944_s24 = smov 0   ;;  %s1040_s0 = inlined_call_operand.vmem [shape: f32[512,16], index: 0, kind: input, shape index: {}]   ;;  %s1041_s1 = inlined_call_operand.vmem [shape: bf16[16,128], index: 1, kind: input, shape index: {}]   ;;  %s1042_s2 = inlined_call_operand.vmem [shape: bf16[128,128], index: 2, kind: input, shape index: {}]   ;;  %s1043_s3 = inlined_call_operand.vmem [shape: bf16[128,128], index: 3, kind: input, shape index: {}]   ;;  %s1044_s4 = inlined_call_operand.vmem [shape: f32[1,128], index: 4, kind: input, shape index: {}]   ;;  %s1045_s5 = inlined_call_operand.vmem [shape: f32[1,128], index: 5, kind: input, shape index: {}]   ;;  %s1046_s6 = inlined_call_operand.vmem [shape: f32[1,128], index: 6, kind: input, shape index: {}]   ;;  %s1047_s7 = inlined_call_operand.vmem [shape: f32[512,8], index: 7, kind: output, shape index: {}]  }
   0x1 LB: > { %s749_s25 = sadd.s32 4294967295, %s902_s24   ;;  %p753_p0 = scmp.ge.s32.totalorder %s902_s24, 1  ;;  %s902_s24 = sphi %s944_s24, %s17_s24  }
   0x2   : > { %p238_p1 = scmp.lt.s32.totalorder %s902_s24, 9 }
   0x4   : > { %p239_p2 = pnand %p753_p0, %p238_p1 }
   0x5   : > { %v879_v0 = vld [vmem:[%s1041_s1] sm:$0xff] (!%p239_p2)   ;;  %s754_s28 = sshll.u32 (!%p239_p2), %s749_s25, 3  ;;  %v881_v2 = vld [vmem:[%s1042_s2 + $0x8] sm:$0xff] (!%p239_p2)   ;;  %v882_v3 = vld [vmem:[%s1042_s2 + $0x10] sm:$0xff] (!%p239_p2)   ;;  %vm310_vm0 = vcmask (!%p239_p2), 130048   ;;  %vm684_vm1 = vcmask (!%p239_p2), 64512  }
   0x6   : > { %242 = sbr.rel (%p239_p2) target bundleno = 690 (0x2b2), region = 48  ;;  %p271_p3 = scmp.lt.s32.totalorder (!%p239_p2), %s754_s28, 63  ;;  %813 = vmatprep.subr.bf16.mxu0 (!%p239_p2), %v879_v0  ;;  %v880_v1 = vld [vmem:[%s1042_s2] sm:$0xff] (!%p239_p2)   ;;  %v883_v13 = vld [vmem:[%s1042_s2 + $0x18] sm:$0xff] (!%p239_p2)   ;;  %v885_v18 = vld [vmem:[%s1042_s2 + $0x28] sm:$0xff] (!%p239_p2)  }
   0x7   : > { %814 = vmatpush3.bf16.msra.mxu0 (!%p239_p2), %v879_v0  ;;  %823 = vmatprep.subr.bf16.mxu1 (!%p239_p2), %v880_v1  ;;  %v884_v16 = vld [vmem:[%s1042_s2 + $0x20] sm:$0xff] (!%p239_p2)   ;;  %v886_v19 = vld [vmem:[%s1042_s2 + $0x30] sm:$0xff] (!%p239_p2)   ;;  %v887_v20 = vld [vmem:[%s1042_s2 + $0x38] sm:$0xff] (!%p239_p2)  }
   0x8   : > { %824 = vmatpush3.bf16.msra.mxu1 (!%p239_p2), %v880_v1  ;;  %v888_v21 = vld [vmem:[%s1043_s3] sm:$0xff] (!%p239_p2)   ;;  %v889_v22 = vld [vmem:[%s1043_s3 + $0x8] sm:$0xff] (!%p239_p2)   ;;  %v890_v23 = vld [vmem:[%s1043_s3 + $0x10] sm:$0xff] (!%p239_p2)  }
   0x9   : > { %825 = vmatprep.subr.bf16.mxu1 (!%p239_p2), %v881_v2  ;;  %847 = vmatprep.subr.bf16.mxu0 (!%p239_p2), %v888_v21  ;;  %v891_v24 = vld [vmem:[%s1043_s3 + $0x18] sm:$0xff] (!%p239_p2)   ;;  %v892_v25 = vld [vmem:[%s1043_s3 + $0x20] sm:$0xff] (!%p239_p2)   ;;  %v893_v26 = vld [vmem:[%s1043_s3 + $0x28] sm:$0xff] (!%p239_p2)  }
   0xa   : > { %v758_v27 = vld [vmem:[%s1044_s4] ss:$0 sm:$0xff] (!%p239_p2)  ;;  %v894_v56 = vld [vmem:[%s1043_s3 + $0x30] sm:$0xff] (!%p239_p2)   ;;  %v895_v57 = vld [vmem:[%s1043_s3 + $0x38] sm:$0xff] (!%p239_p2)  }
   0xb   : > { %v764_v58 = vld [vmem:[%s1045_s5] ss:$0 sm:$0xff] (!%p239_p2) }
   0xc   : > { %826 = vmatpush3.bf16.msra.mxu1 (!%p239_p2), %v881_v2 }
   0xd   : > { %s1049_s28 = smov (!%p271_p3, %s754_s28), 63  ;;  %827 = vmatprep.subr.bf16.mxu1 %v882_v3 }
   0xe   : > { %s755_s10 = sshll.u32 %s1049_s28, 3 }
   0xf   : > { %s274_s13 = scalar_lea.vmem %s1040_s0, %s755_s10  ;;  %s280_s9 = scalar_lea.vmem %s1047_s7, %s755_s10 }
  0x10   : > { %v283_v4 = vld [vmem:[%s274_s13] sm:$0xff]  ;;  %v284_v5 = vld [vmem:[%s274_s13 + $0x8] sm:$0xff]  ;;  %v285_v6 = vld [vmem:[%s274_s13 + $0x10] sm:$0xff]  ;;  %828 = vmatpush3.bf16.msra.mxu1 %v882_v3 }
  0x11   : > { %v291_v7 = vpack.c.bf16 %v284_v5, %v283_v4  ;;  %v286_v8 = vld [vmem:[%s274_s13 + $0x18] sm:$0xff]  ;;  %v287_v9 = vld [vmem:[%s274_s13 + $0x20] sm:$0xff]  ;;  %v288_v10 = vld [vmem:[%s274_s13 + $0x28] sm:$0xff]  ;;  %829 = vmatprep.subr.bf16.mxu1 %v883_v13 }
  0x12   : > { %v292_v11 = vpack.c.bf16 %v286_v8, %v285_v6  ;;  %v293_v12 = vpack.c.bf16 %v288_v10, %v287_v9  ;;  %v289_v14 = vld [vmem:[%s274_s13 + $0x30] sm:$0xff]  ;;  %v290_v15 = vld [vmem:[%s274_s13 + $0x38] sm:$0xff] }
  0x13   : > { %815 = vmatprep.mubr.msk.bf16.mxu0 %vm310_vm0, %v291_v7  ;;  %v294_v17 = vpack.c.bf16 %v290_v15, %v289_v14 }
  0x14   : > { %816 = vmatmul.mubr.msk.bf16.vlgmr.msra.gmra.mrb[0].mxu0 %vm310_vm0, %v292_v11  ;;  %830 = vmatpush3.bf16.msra.mxu1 %v883_v13 }
  0x15   : > { %819 = vmatprep.mubr.msk.bf16.mxu0 %vm310_vm0, %v293_v12  ;;  %831 = vmatprep.subr.bf16.mxu1 %v884_v16 }
  0x16   : > { %848 = vmatpush3.bf16.msra.mxu0 %v888_v21 }
  0x17   : > { %849 = vmatprep.subr.bf16.mxu0 %v889_v22 }
  0x18   : > { %832 = vmatpush3.bf16.msra.mxu1 %v884_v16 }
  0x19   : > { %833 = vmatprep.subr.bf16.mxu1 %v885_v18 }
  0x1a   : > { %850 = vmatpush3.bf16.msra.mxu0 %v889_v22 }
  0x1b   : > { %851 = vmatprep.subr.bf16.mxu0 %v890_v23 }
  0x1c   : > { %820 = vmatmul.mubr.msk.bf16.gmra.mrb[4].mxu0 %vm310_vm0, %v294_v17  ;;  %834 = vmatpush3.bf16.msra.mxu1 %v885_v18 }
  0x1d   : > { %835 = vmatprep.subr.bf16.mxu1 %v886_v19 }
  0x1e   : > { %852 = vmatpush3.bf16.msra.mxu0 %v890_v23  ;;  %v773_v23 = vld [vmem:[%s1046_s6] ss:$0 sm:$0xff] }
  0x1f   : > { %853 = vmatprep.subr.bf16.mxu0 %v891_v24 }
  0x20   : > { %836 = vmatpush3.bf16.msra.mxu1 %v886_v19 }
  0x21   : > { %837 = vmatprep.subr.bf16.mxu1 %v887_v20 }
  0x22   : > { %854 = vmatpush3.bf16.msra.mxu0 %v891_v24 }
  0x23   : > { %855 = vmatprep.subr.bf16.mxu0 %v892_v25 }
  0x24   : > { %838 = vmatpush3.bf16.msra.mxu1 %v887_v20 }
  0x26   : > { %856 = vmatpush3.bf16.msra.mxu0 %v892_v25 }
  0x27   : > { %857 = vmatprep.subr.bf16.mxu0 %v893_v26 }
  0x2a   : > { %858 = vmatpush3.bf16.msra.mxu0 %v893_v26 }
  0x2b   : > { %859 = vmatprep.subr.bf16.mxu0 %v894_v56 }
  0x2e   : > { %860 = vmatpush3.bf16.msra.mxu0 %v894_v56 }
  0x2f   : > { %861 = vmatprep.subr.bf16.mxu0 %v895_v57 }
  0x32   : > { %862 = vmatpush3.bf16.msra.mxu0 %v895_v57 }
  0xe7   : > { %v817_v28 = vpop.f32.mrb[0].mxu0 }
  0xe8   : > { %v366_v29 = vadd.f32 %v817_v28, %v758_v27  ;;  %v357_v30 = vpop.f32.mrb[1].mxu0 }
  0xe9   : > { %v358_v31 = vadd.f32 %v758_v27, %v357_v30  ;;  %v818_v32 = vpop.f32.mrb[2].mxu0 }
  0xea   : > { %v369_v33 = vadd.f32 %v818_v32, %v758_v27  ;;  %v360_v34 = vpop.f32.mrb[3].mxu0  ;;  %v390_v36 = vmax.f32 %v366_v29, 0.0 }
  0xeb   : > { %v361_v35 = vadd.f32 %v758_v27, %v360_v34  ;;  %v388_v38 = vmax.f32 %v358_v31, 0.0 }
  0xec   : > { %v391_v37 = vmax.f32 %v369_v33, 0.0 }
  0xed   : > { %v389_v39 = vmax.f32 %v361_v35, 0.0 }
  0xee   : > { %v397_v40 = vpack.c.bf16 %v391_v37, %v390_v36 }
  0xef   : > { %v821_v41 = vpop.f32.mrb[4].mxu0  ;;  %v396_v42 = vpack.c.bf16 %v389_v39, %v388_v38 }
  0xf0   : > { %v382_v43 = vadd.f32 %v821_v41, %v758_v27  ;;  %v373_v44 = vpop.f32.mrb[5].mxu0 }
  0xf1   : > { %v374_v45 = vadd.f32 %v758_v27, %v373_v44  ;;  %v822_v46 = vpop.f32.mrb[6].mxu0  ;;  %839 = vmatprep.mubr.bf16.mxu1 %v396_v42 }
  0xf2   : > { %v385_v47 = vadd.f32 %v822_v46, %v758_v27  ;;  %v376_v48 = vpop.f32.mrb[7].mxu0  ;;  %840 = vmatmul.mubr.bf16.vlgmr.msra.gmra.mrb[0].mxu1 %v397_v40  ;;  %v394_v50 = vmax.f32 %v382_v43, 0.0 }
  0xf3   : > { %v377_v49 = vadd.f32 %v758_v27, %v376_v48  ;;  %v392_v52 = vmax.f32 %v374_v45, 0.0 }
  0xf4   : > { %v395_v51 = vmax.f32 %v385_v47, 0.0 }
  0xf5   : > { %v393_v53 = vmax.f32 %v377_v49, 0.0 }
  0xf6   : > { %v399_v54 = vpack.c.bf16 %v395_v51, %v394_v50 }
  0xf7   : > { %v398_v55 = vpack.c.bf16 %v393_v53, %v392_v52 }
  0xf9   : > { %843 = vmatprep.mubr.bf16.mxu1 %v398_v55 }
  0xfa   : > { %844 = vmatmul.mubr.bf16.gmra.mrb[4].mxu1 %v399_v54 }
 0x1c5   : > { %v841_v59 = vpop.f32.mrb[0].mxu1 }
 0x1c6   : > { %v514_v60 = vadd.f32 %v841_v59, %v764_v58  ;;  %v505_v61 = vpop.f32.mrb[1].mxu1 }
 0x1c7   : > { %v506_v62 = vadd.f32 %v764_v58, %v505_v61  ;;  %v842_v63 = vpop.f32.mrb[2].mxu1 }
 0x1c8   : > { %v517_v0 = vadd.f32 %v842_v63, %v764_v58  ;;  %v508_v1 = vpop.f32.mrb[3].mxu1  ;;  %v538_v3 = vmax.f32 %v514_v60, 0.0 }
 0x1c9   : > { %v509_v2 = vadd.f32 %v764_v58, %v508_v1  ;;  %v536_v5 = vmax.f32 %v506_v62, 0.0 }
 0x1ca   : > { %v539_v4 = vmax.f32 %v517_v0, 0.0 }
 0x1cb   : > { %v537_v6 = vmax.f32 %v509_v2, 0.0 }
 0x1cc   : > { %v545_v7 = vpack.c.bf16 %v539_v4, %v538_v3 }
 0x1cd   : > { %v544_v8 = vpack.c.bf16 %v537_v6, %v536_v5  ;;  %v845_v9 = vpop.f32.mrb[4].mxu1 }
 0x1ce   : > { %v530_v10 = vadd.f32 %v845_v9, %v764_v58  ;;  %v521_v11 = vpop.f32.mrb[5].mxu1 }
 0x1cf   : > { %v522_v12 = vadd.f32 %v764_v58, %v521_v11  ;;  %v846_v13 = vpop.f32.mrb[6].mxu1  ;;  %863 = vmatprep.mubr.bf16.mxu0 %v544_v8 }
 0x1d0   : > { %v533_v14 = vadd.f32 %v846_v13, %v764_v58  ;;  %v524_v15 = vpop.f32.mrb[7].mxu1  ;;  %864 = vmatmul.mubr.bf16.vlgmr.msra.gmra.mrb[8].mxu0 %v545_v7  ;;  %v542_v17 = vmax.f32 %v530_v10, 0.0 }
 0x1d1   : > { %v525_v16 = vadd.f32 %v764_v58, %v524_v15  ;;  %v540_v19 = vmax.f32 %v522_v12, 0.0 }
 0x1d2   : > { %v543_v18 = vmax.f32 %v533_v14, 0.0 }
 0x1d3   : > { %v541_v20 = vmax.f32 %v525_v16, 0.0 }
 0x1d4   : > { %v547_v21 = vpack.c.bf16 %v543_v18, %v542_v17 }
 0x1d5   : > { %v546_v22 = vpack.c.bf16 %v541_v20, %v540_v19 }
 0x1d7   : > { %867 = vmatprep.mubr.bf16.mxu0 %v546_v22 }
 0x1d8   : > { %868 = vmatmul.mubr.bf16.gmra.mrb[12].mxu0 %v547_v21 }
 0x2a3   : > { %v865_v24 = vpop.f32.mrb[8].mxu0 }
 0x2a4   : > { %v662_v25 = vadd.f32 %v865_v24, %v773_v23  ;;  %v653_v26 = vpop.f32.mrb[9].mxu0 }
 0x2a5   : > { %v654_v27 = vadd.f32 %v773_v23, %v653_v26  ;;  %v866_v28 = vpop.f32.mrb[10].mxu0 }
 0x2a6   : > { %687 = vst.msk [vmem:[%s280_s9 + $0x10] sm:$0xff] %vm684_vm1, %v662_v25  ;;  %v665_v29 = vadd.f32 %v866_v28, %v773_v23  ;;  %v656_v30 = vpop.f32.mrb[11].mxu0 }
 0x2a7   : > { %685 = vst.msk [vmem:[%s280_s9] sm:$0xff] %vm684_vm1, %v654_v27  ;;  %v657_v31 = vadd.f32 %v773_v23, %v656_v30 }
 0x2a8   : > { %688 = vst.msk [vmem:[%s280_s9 + $0x18] sm:$0xff] %vm684_vm1, %v665_v29 }
 0x2a9   : > { %686 = vst.msk [vmem:[%s280_s9 + $0x8] sm:$0xff] %vm684_vm1, %v657_v31 }
 0x2ab   : > { %v869_v32 = vpop.f32.mrb[12].mxu0 }
 0x2ac   : > { %v678_v33 = vadd.f32 %v869_v32, %v773_v23  ;;  %v669_v34 = vpop.f32.mrb[13].mxu0 }
 0x2ad   : > { %v670_v35 = vadd.f32 %v773_v23, %v669_v34  ;;  %v870_v36 = vpop.f32.mrb[14].mxu0 }
 0x2ae   : > { %691 = vst.msk [vmem:[%s280_s9 + $0x30] sm:$0xff] %vm684_vm1, %v678_v33  ;;  %v681_v37 = vadd.f32 %v870_v36, %v773_v23  ;;  %v672_v38 = vpop.f32.mrb[15].mxu0 }
 0x2af   : > { %689 = vst.msk [vmem:[%s280_s9 + $0x20] sm:$0xff] %vm684_vm1, %v670_v35  ;;  %v673_v39 = vadd.f32 %v773_v23, %v672_v38 }
 0x2b0   : > { %692 = vst.msk [vmem:[%s280_s9 + $0x38] sm:$0xff] %vm684_vm1, %v681_v37 }
 0x2b1   : > { %690 = vst.msk [vmem:[%s280_s9 + $0x28] sm:$0xff] %vm684_vm1, %v673_v39 }
 0x2b2 PF: > { %s17_s24 = sadd.s32 1, %s902_s24  }
 0x2b3   : > { %p14_p4 = scmp.ge.s32.totalorder %s17_s24, 10  }
 0x2b5   :  { %16 = sbr.rel (!%p14_p4) target bundleno = 1 (0x1), region = 78 }

</bundles_post_ra>
